<compile_context>
chip_gen: v7x
topology: tpu7x:2x2x1
jax: 0.10.0
libtpu: 0.0.40
codegen_flags: <defaults>
</compile_context>

<pallas_src>
import functools

import jax
import jax.numpy as jnp
from jax.experimental import pallas as pl
from jax.experimental.pallas import tpu as pltpu


def _tile_rows(t, reps):
    """(Bb, N, C) -> (Bb, reps*N, C); row j of the result holds t[:, j % N, :]."""
    b, n, c = t.shape
    return jnp.broadcast_to(t[:, None, :, :], (b, reps, n, c)).reshape(b, reps * n, c)


def _attention_kernel(x_ref, wqkv_ref, wp_ref, bproj_ref, mask_ref, *rest,
                      num_heads, has_qkv_bias):
    if has_qkv_bias:
        bqkv_ref, o_ref = rest
    else:
        (o_ref,) = rest

    Bb, N, C = x_ref.shape
    H = num_heads

    # ---- Stage 1: fused QKV projection — ONE wide MXU matmul for the block ---
    x2d = x_ref[...].reshape(Bb * N, C)                       # sublane-only merge
    qkv = jnp.dot(x2d, wqkv_ref[...],
                  preferred_element_type=jnp.float32)         # (Bb*N, 3C) f32
    if has_qkv_bias:
        qkv = qkv + bqkv_ref[...]                             # (1, 3C) broadcast
    qkv = qkv.astype(jnp.bfloat16)

    q = qkv[:, 0 * C:1 * C].reshape(Bb, N, C)                 # scale folded into Wq
    k = qkv[:, 1 * C:2 * C].reshape(Bb, N, C)
    v = qkv[:, 2 * C:3 * C].reshape(Bb, N, C)

    # ---- Stage 2: all-head attention as three WIDE batched matmuls ----------
    # K/V are block-repeated along sublanes (row j = h*N + m) and masked by the
    # block-diagonal head mask M[h*N+m, c] = (c//D == h), so
    #   scores[b, n, h*N+m] = sum_d q[b,n,h*D+d] * k[b,m,h*D+d]
    # comes out of a single (N, C) x (H*N, C)^T contraction per batch element.
    # Masked-out terms are exact zeros, so this is numerically identical to the
    # per-head formulation.
    mask = mask_ref[...]                                      # (H*N, C) bf16 0/1
    k_blk = _tile_rows(k, H) * mask                           # (Bb, H*N, C)
    v_blk = _tile_rows(v, H) * mask                           # (Bb, H*N, C)

    s = jnp.einsum('bnc,bjc->bnj', q, k_blk,
                   preferred_element_type=jnp.float32)        # (Bb, N, H*N)

    # Stable softmax.  The shift uses the row max over ALL heads (a per-(b,n)
    # constant), which keeps exp() <= 1 and cancels in the per-head
    # normalization below.  A true per-head max would need a lane segment
    # reduce; only needed if per-head score ranges differ by ~>80.
    s = s - jnp.max(s, axis=-1, keepdims=True)
    e = jnp.exp(s).astype(jnp.bfloat16)                       # (Bb, N, H*N)

    # Unnormalized context and per-head softmax denominators, both as wide
    # matmuls.  The head mask replicates each head's denominator across its D
    # lanes, so normalization is a plain elementwise multiply.
    ctx = jnp.einsum('bnj,bjc->bnc', e, v_blk,
                     preferred_element_type=jnp.float32)      # (Bb, N, C)
    den = jnp.einsum('bnj,bjc->bnc', e,
                     jnp.broadcast_to(mask, (Bb, H * N, C)),
                     preferred_element_type=jnp.float32)      # (Bb, N, C)
    # attn_drop (p=0.0) -> no-op.
    ctx = ctx * pl.reciprocal(den, approx=True)

    # ---- Stage 3: output projection; head-concat is already the lane order ---
    # ctx lanes are ordered c = h*D + d, exactly the PyTorch
    # (attn @ v).transpose(1, 2).reshape(B, N, C) concat, so the projection is
    # one (Bb*N, C) @ (C, C) matmul with the head reduction accumulated in the
    # MXU.
    y = jnp.dot(ctx.astype(jnp.bfloat16).reshape(Bb * N, C), wp_ref[...],
                preferred_element_type=jnp.float32)           # (Bb*N, C)
    y = y + bproj_ref[...]
    # proj_drop (p=0.0) -> no-op.  Single coalesced store of the whole block.
    o_ref[...] = y.reshape(Bb, N, C).astype(o_ref.dtype)


def _default_block_b(batch):
    # v7x has 2 TensorCores per chip: give the 'parallel' grid axis >=2 points.
    # Single-TC generations (v5e / v6e): one grid step for the whole batch to
    # avoid paying the ~0.35us per-step overhead for nothing.
    try:
        kind = jax.devices()[0].device_kind.lower()
    except Exception:
        kind = ""
    if "v7" in kind and batch >= 2 and batch % 2 == 0:
        return batch // 2
    return batch


def attention_pallas(x, w_qkv, b_qkv, w_proj, b_proj, *, num_heads,
                     qk_scale=None, block_b=None):
    B, N, C = x.shape
    H = num_heads
    D = C // H
    scale = qk_scale if qk_scale is not None else D ** (-0.5)

    if block_b is None:
        block_b = _default_block_b(B)
    assert B % block_b == 0, "block_b must divide B"

    # ---- one-time parameter transforms (outside the kernel) ------------------
    # PyTorch Linear stores W as (out, in); the kernel computes x @ W^T.
    w_qkv_t = jnp.asarray(w_qkv, jnp.float32).T               # (C, 3C) = [Wq^T|Wk^T|Wv^T]
    w_qkv_t = w_qkv_t.at[:, 0:C].multiply(scale)              # fold softmax scale into Wq
    w_qkv_bf = w_qkv_t.astype(jnp.bfloat16)
    w_proj_t = jnp.asarray(w_proj, jnp.float32).T.astype(jnp.bfloat16)   # (C, C)
    b_proj_2d = jnp.asarray(b_proj, jnp.float32).reshape(1, C)

    # Block-diagonal head mask: mask[h*N+m, c] = 1 iff channel c belongs to head h.
    row_head = jnp.repeat(jnp.arange(H, dtype=jnp.int32), N)  # (H*N,)
    col_head = jnp.repeat(jnp.arange(H, dtype=jnp.int32), D)  # (C,)
    mask = (row_head[:, None] == col_head[None, :]).astype(jnp.bfloat16)  # (H*N, C)

    x_bf = x.astype(jnp.bfloat16)

    has_qkv_bias = b_qkv is not None
    inputs = [x_bf, w_qkv_bf, w_proj_t, b_proj_2d, mask]
    in_specs = [
        pl.BlockSpec((block_b, N, C), lambda i: (i, 0, 0)),   # x block
        pl.BlockSpec((C, 3 * C), lambda i: (0, 0)),           # fused W_qkv^T (Q scaled)
        pl.BlockSpec((C, C), lambda i: (0, 0)),               # W_proj^T
        pl.BlockSpec((1, C), lambda i: (0, 0)),               # b_proj
        pl.BlockSpec((H * N, C), lambda i: (0, 0)),           # head mask
    ]
    if has_qkv_bias:  # qkv_bias=True path (module default False -> skipped)
        b_qkv_f = jnp.asarray(b_qkv, jnp.float32)
        b_qkv_f = b_qkv_f.at[0:C].multiply(scale).reshape(1, 3 * C)
        inputs.append(b_qkv_f)
        in_specs.append(pl.BlockSpec((1, 3 * C), lambda i: (0, 0)))

    kernel = functools.partial(_attention_kernel, num_heads=H,
                               has_qkv_bias=has_qkv_bias)

    return pl.pallas_call(
        kernel,
        out_shape=jax.ShapeDtypeStruct((B, N, C), x.dtype),
        grid_spec=pltpu.PrefetchScalarGridSpec(
            num_scalar_prefetch=0,
            grid=(B // block_b,),
            in_specs=in_specs,
            out_specs=pl.BlockSpec((block_b, N, C), lambda i: (i, 0, 0)),
        ),
        compiler_params=pltpu.CompilerParams(
            dimension_semantics=("parallel",)),
    )(*inputs)


def attention_ref(x, w_qkv, b_qkv, w_proj, b_proj, *, num_heads, qk_scale=None):
    """Pure-JAX f32 reference mirroring the PyTorch forward."""
    B, N, C = x.shape
    D = C // num_heads
    scale = qk_scale if qk_scale is not None else D ** (-0.5)

    bq = jnp.zeros((3 * C,), x.dtype) if b_qkv is None else b_qkv
    qkv = x @ w_qkv.T + bq                                   # (B, N, 3C)
    qkv = qkv.reshape(B, N, 3, num_heads, D)
    qkv = jnp.transpose(qkv, (2, 0, 3, 1, 4))                # (3, B, H, N, D)
    q, k, v = qkv[0], qkv[1], qkv[2]

    attn = jnp.einsum("bhnd,bhmd->bhnm", q, k) * scale
    attn = jax.nn.softmax(attn, axis=-1)
    out = jnp.einsum("bhnm,bhmd->bhnd", attn, v)             # (B, H, N, D)
    out = jnp.transpose(out, (0, 2, 1, 3)).reshape(B, N, C)
    return out @ w_proj.T + b_proj


if __name__ == "__main__":
    # Small shapes consistent with the module defaults (num_heads=12 -> C % 12 == 0).
    B, N, C, H = 2, 16, 48, 12

    key = jax.random.PRNGKey(0)
    kx, kw1, kw2, kb2 = jax.random.split(key, 4)

    x = jax.random.normal(kx, (B, N, C), dtype=jnp.float32)
    w_qkv = jax.random.normal(kw1, (3 * C, C), dtype=jnp.float32) * 0.05
    b_qkv = None                               # qkv_bias=False (module default)
    w_proj = jax.random.normal(kw2, (C, C), dtype=jnp.float32) * 0.05
    b_proj = jax.random.normal(kb2, (C,), dtype=jnp.float32) * 0.05

    out = attention_pallas(x, w_qkv, b_qkv, w_proj, b_proj, num_heads=H)
    out = jax.block_until_ready(out)

    ref = attention_ref(x, w_qkv, b_qkv, w_proj, b_proj, num_heads=H)
    assert out.shape == (B, N, C)
    # bf16 MXU inputs (f32 accumulation / f32 softmax shift) vs the pure-f32 reference.
    assert jnp.allclose(out, ref, atol=2e-2, rtol=2e-2), "mismatch vs reference"

    print("KERNEL_OK")
</pallas_src>

<mosaic_0001>
module attributes {stable_mosaic.version = 11 : i64} {
  func.func @_attention_kernel(%arg0: i32, %arg1: memref<2x16x48xbf16, #tpu.memory_space<vmem>>, %arg2: memref<48x144xbf16, #tpu.memory_space<vmem>>, %arg3: memref<48x48xbf16, #tpu.memory_space<vmem>>, %arg4: memref<1x48xf32, #tpu.memory_space<vmem>>, %arg5: memref<192x48xbf16, #tpu.memory_space<vmem>>, %arg6: memref<2x16x48xf32, #tpu.memory_space<vmem>>) attributes {dimension_semantics = [#tpu.dimension_semantics<parallel>], iteration_bounds = array<i64: 1>, scalar_prefetch = 0 : i64, scratch_operands = 0 : i64, tpu.core_type = #tpu.core_type<tc>, window_params = [{transform_indices = @transform_0, window_bounds = array<i64: 2, 16, 48>}, {pipeline_mode = #tpu.pipeline_mode<synchronous>, transform_indices = @transform_1, window_bounds = array<i64: 48, 144>}, {pipeline_mode = #tpu.pipeline_mode<synchronous>, transform_indices = @transform_2, window_bounds = array<i64: 48, 48>}, {pipeline_mode = #tpu.pipeline_mode<synchronous>, transform_indices = @transform_3, window_bounds = array<i64: 1, 48>}, {pipeline_mode = #tpu.pipeline_mode<synchronous>, transform_indices = @transform_4, window_bounds = array<i64: 192, 48>}, {transform_indices = @transform_5, window_bounds = array<i64: 2, 16, 48>}]} {
    %c0 = arith.constant 0 : index
    %c0_0 = arith.constant 0 : index
    %c0_1 = arith.constant 0 : index
    %0 = vector.load %arg1[%c0, %c0_0, %c0_1] : memref<2x16x48xbf16, #tpu.memory_space<vmem>>, vector<2x16x48xbf16>
    %1 = vector.shape_cast %0 : vector<2x16x48xbf16> to vector<32x48xbf16>
    %c0_2 = arith.constant 0 : index
    %c0_3 = arith.constant 0 : index
    %2 = vector.load %arg2[%c0_2, %c0_3] : memref<48x144xbf16, #tpu.memory_space<vmem>>, vector<48x144xbf16>
    %cst = arith.constant dense<0.000000e+00> : vector<32x144xf32>
    %3 = tpu.matmul %1, %2, %cst {dimension_numbers = #tpu.dot_dimension_numbers<[1], [0], [0], [1], [0, 0, 1, 1], [], []>} : vector<32x48xbf16>, vector<48x144xbf16>, vector<32x144xf32> -> vector<32x144xf32>
    %4 = arith.truncf %3 : vector<32x144xf32> to vector<32x144xbf16>
    %5 = vector.extract_strided_slice %4 {offsets = [0, 0], sizes = [32, 48], strides = [1, 1]} : vector<32x144xbf16> to vector<32x48xbf16>
    %6 = vector.shape_cast %5 : vector<32x48xbf16> to vector<2x16x48xbf16>
    %7 = vector.extract_strided_slice %4 {offsets = [0, 48], sizes = [32, 48], strides = [1, 1]} : vector<32x144xbf16> to vector<32x48xbf16>
    %8 = vector.shape_cast %7 : vector<32x48xbf16> to vector<2x16x48xbf16>
    %9 = vector.extract_strided_slice %4 {offsets = [0, 96], sizes = [32, 48], strides = [1, 1]} : vector<32x144xbf16> to vector<32x48xbf16>
    %10 = vector.shape_cast %9 : vector<32x48xbf16> to vector<2x16x48xbf16>
    %c0_4 = arith.constant 0 : index
    %c0_5 = arith.constant 0 : index
    %11 = vector.load %arg5[%c0_4, %c0_5] : memref<192x48xbf16, #tpu.memory_space<vmem>>, vector<192x48xbf16>
    %12 = vector.shape_cast %8 : vector<2x16x48xbf16> to vector<2x1x16x48xbf16>
    %13 = vector.shape_cast %12 : vector<2x1x16x48xbf16> to vector<2x1x16x48xbf16>
    %14 = vector.broadcast %13 : vector<2x1x16x48xbf16> to vector<2x12x16x48xbf16>
    %15 = vector.shape_cast %14 : vector<2x12x16x48xbf16> to vector<2x192x48xbf16>
    %16 = vector.shape_cast %11 : vector<192x48xbf16> to vector<1x192x48xbf16>
    %17 = vector.broadcast %16 : vector<1x192x48xbf16> to vector<2x192x48xbf16>
    %18 = arith.mulf %15, %17 : vector<2x192x48xbf16>
    %19 = vector.shape_cast %10 : vector<2x16x48xbf16> to vector<2x1x16x48xbf16>
    %20 = vector.shape_cast %19 : vector<2x1x16x48xbf16> to vector<2x1x16x48xbf16>
    %21 = vector.broadcast %20 : vector<2x1x16x48xbf16> to vector<2x12x16x48xbf16>
    %22 = vector.shape_cast %21 : vector<2x12x16x48xbf16> to vector<2x192x48xbf16>
    %23 = vector.shape_cast %11 : vector<192x48xbf16> to vector<1x192x48xbf16>
    %24 = vector.broadcast %23 : vector<1x192x48xbf16> to vector<2x192x48xbf16>
    %25 = arith.mulf %22, %24 : vector<2x192x48xbf16>
    "tpu.trace_start"() <{level = 10 : i32, message = "bnc,bjc->bnj"}> : () -> ()
    %cst_6 = arith.constant dense<0.000000e+00> : vector<2x16x192xf32>
    %26 = tpu.matmul %6, %18, %cst_6 {dimension_numbers = #tpu.dot_dimension_numbers<[2], [2], [1], [1], [0, 0, 0, 1, 1, 1], [0], [0]>} : vector<2x16x48xbf16>, vector<2x192x48xbf16>, vector<2x16x192xf32> -> vector<2x16x192xf32>
    "tpu.trace_stop"() : () -> ()
    %cst_7 = arith.constant dense<0xFF800000> : vector<2x16xf32>
    %27 = vector.multi_reduction <maximumf>, %26, %cst_7 [2] : vector<2x16x192xf32> to vector<2x16xf32>
    %28 = vector.shape_cast %27 : vector<2x16xf32> to vector<2x16x1xf32>
    %29 = vector.broadcast %28 : vector<2x16x1xf32> to vector<2x16x192xf32>
    %30 = arith.subf %26, %29 : vector<2x16x192xf32>
    %31 = math.exp %30 : vector<2x16x192xf32>
    %32 = arith.truncf %31 : vector<2x16x192xf32> to vector<2x16x192xbf16>
    "tpu.trace_start"() <{level = 10 : i32, message = "bnj,bjc->bnc"}> : () -> ()
    %cst_8 = arith.constant dense<0.000000e+00> : vector<2x16x48xf32>
    %33 = tpu.matmul %32, %25, %cst_8 {dimension_numbers = #tpu.dot_dimension_numbers<[2], [1], [1], [2], [0, 0, 0, 1, 1, 2], [0], [0]>} : vector<2x16x192xbf16>, vector<2x192x48xbf16>, vector<2x16x48xf32> -> vector<2x16x48xf32>
    "tpu.trace_stop"() : () -> ()
    %34 = vector.shape_cast %11 : vector<192x48xbf16> to vector<1x192x48xbf16>
    %35 = vector.broadcast %34 : vector<1x192x48xbf16> to vector<2x192x48xbf16>
    "tpu.trace_start"() <{level = 10 : i32, message = "bnj,bjc->bnc"}> : () -> ()
    %cst_9 = arith.constant dense<0.000000e+00> : vector<2x16x48xf32>
    %36 = tpu.matmul %32, %35, %cst_9 {dimension_numbers = #tpu.dot_dimension_numbers<[2], [1], [1], [2], [0, 0, 0, 1, 1, 2], [0], [0]>} : vector<2x16x192xbf16>, vector<2x192x48xbf16>, vector<2x16x48xf32> -> vector<2x16x48xf32>
    "tpu.trace_stop"() : () -> ()
    %37 = tpu.reciprocal %36 {approx = true} : vector<2x16x48xf32> -> vector<2x16x48xf32>
    %38 = arith.mulf %33, %37 : vector<2x16x48xf32>
    %39 = arith.truncf %38 : vector<2x16x48xf32> to vector<2x16x48xbf16>
    %40 = vector.shape_cast %39 : vector<2x16x48xbf16> to vector<32x48xbf16>
    %c0_10 = arith.constant 0 : index
    %c0_11 = arith.constant 0 : index
    %41 = vector.load %arg3[%c0_10, %c0_11] : memref<48x48xbf16, #tpu.memory_space<vmem>>, vector<48x48xbf16>
    %cst_12 = arith.constant dense<0.000000e+00> : vector<32x48xf32>
    %42 = tpu.matmul %40, %41, %cst_12 {dimension_numbers = #tpu.dot_dimension_numbers<[1], [0], [0], [1], [0, 0, 1, 1], [], []>} : vector<32x48xbf16>, vector<48x48xbf16>, vector<32x48xf32> -> vector<32x48xf32>
    %c0_13 = arith.constant 0 : index
    %c0_14 = arith.constant 0 : index
    %43 = vector.load %arg4[%c0_13, %c0_14] : memref<1x48xf32, #tpu.memory_space<vmem>>, vector<1x48xf32>
    %44 = vector.broadcast %43 : vector<1x48xf32> to vector<32x48xf32>
    %45 = arith.addf %42, %44 : vector<32x48xf32>
    %46 = vector.shape_cast %45 : vector<32x48xf32> to vector<2x16x48xf32>
    %c0_15 = arith.constant 0 : index
    %c0_16 = arith.constant 0 : index
    %c0_17 = arith.constant 0 : index
    %47 = vector.load %arg6[%c0_15, %c0_16, %c0_17] : memref<2x16x48xf32, #tpu.memory_space<vmem>>, vector<2x16x48xf32>
    tpu.vector_store %arg6[%c0_15, %c0_16, %c0_17], %46 {strides = array<i32>} : memref<2x16x48xf32, #tpu.memory_space<vmem>>, vector<2x16x48xf32>,
    return
  }
  func.func @transform_0(%arg0: i32) -> (i32, i32, i32) {
    %c0_i32 = arith.constant 0 : i32
    %c0_i32_0 = arith.constant 0 : i32
    %c0_i32_1 = arith.constant 0 : i32
    return %arg0, %c0_i32, %c0_i32_0 : i32, i32, i32
  }
  func.func @transform_1(%arg0: i32) -> (i32, i32) {
    %c0_i32 = arith.constant 0 : i32
    %c0_i32_0 = arith.constant 0 : i32
    %c0_i32_1 = arith.constant 0 : i32
    return %c0_i32, %c0_i32_0 : i32, i32
  }
  func.func @transform_2(%arg0: i32) -> (i32, i32) {
    %c0_i32 = arith.constant 0 : i32
    %c0_i32_0 = arith.constant 0 : i32
    %c0_i32_1 = arith.constant 0 : i32
    return %c0_i32, %c0_i32_0 : i32, i32
  }
  func.func @transform_3(%arg0: i32) -> (i32, i32) {
    %c0_i32 = arith.constant 0 : i32
    %c0_i32_0 = arith.constant 0 : i32
    %c0_i32_1 = arith.constant 0 : i32
    return %c0_i32, %c0_i32_0 : i32, i32
  }
  func.func @transform_4(%arg0: i32) -> (i32, i32) {
    %c0_i32 = arith.constant 0 : i32
    %c0_i32_0 = arith.constant 0 : i32
    %c0_i32_1 = arith.constant 0 : i32
    return %c0_i32, %c0_i32_0 : i32, i32
  }
  func.func @transform_5(%arg0: i32) -> (i32, i32, i32) {
    %c0_i32 = arith.constant 0 : i32
    %c0_i32_0 = arith.constant 0 : i32
    %c0_i32_1 = arith.constant 0 : i32
    return %arg0, %c0_i32, %c0_i32_0 : i32, i32, i32
  }
}

</mosaic_0001>

<bundles_post_ra>
// kernel: tpu_custom_call.1
= control target key start
LH: loop header
LB: loop body
LE: loop exit
PB: predicated region body
PF: predicated region fallthrough
CT: control target
= control target key end

     0   :  { %v1276_v2 = vmov 0   ;;  %s1277_s9 = smov 48   ;;  %vm72_vm0 = vcmask 392192   ;;  %s1828_s0 = inlined_call_operand.vmem [shape: bf16[2,16,48], index: 0, kind: input, shape index: {}]   ;;  %s1829_s1 = inlined_call_operand.vmem [shape: bf16[48,144], index: 1, kind: input, shape index: {}]   ;;  %s1830_s2 = inlined_call_operand.vmem [shape: bf16[48,48], index: 2, kind: input, shape index: {}]   ;;  %s1831_s3 = inlined_call_operand.vmem [shape: f32[1,48], index: 3, kind: input, shape index: {}]   ;;  %s1832_s4 = inlined_call_operand.vmem [shape: bf16[192,48], index: 4, kind: input, shape index: {}]   ;;  %s1833_s5 = inlined_call_operand.hbm [shape: f32[2,16,48], index: 5, kind: output, shape index: {}]  }
   0x1   :  { %v1193_v0 = vld [vmem:[%s1829_s1 + $0x4] ss:$8 sps:$4 sm:$0xff]   ;;  %v1195_v1 = vld [vmem:[%s1829_s1] ss:$8 sps:$4 sm:$0xff]   ;;  %111 = vmatprep.mubr.bf16.mxu0 %v1276_v2  ;;  %439 = vmatprep.subr.bf16.mxu1 %v1276_v2  ;;  %v1196_v3 = vld [vmem:[%s1829_s1 + $0x14] ss:$8 sps:$4 sm:$0xff]  }
   0x2   :  { %79 = vmatprep.subr.bf16.mxu0 %v1193_v0  ;;  %471 = vmatprep.mubr.bf16.mxu1 %v1276_v2  ;;  %v1198_v4 = vld [vmem:[%s1829_s1 + $0x10] ss:$8 sps:$4 sm:$0xff]   ;;  %v1199_v5 = vld [vmem:[%s1829_s1 + $0x24] ss:$8 sps:$4 sm:$0xff]   ;;  %v1201_v6 = vld [vmem:[%s1829_s1 + $0x20] ss:$8 sps:$4 sm:$0xff]  }
   0x3   :  { %80 = vmatpush1.bf16.msra.mxu0 %v1195_v1  ;;  %v1338_v7 = vld [vmem:[%s1832_s4 + $0x10] sm:$0xff]   ;;  %v1343_v8 = vld [vmem:[%s1832_s4] sm:$0xff]   ;;  %v1350_v9 = vld [vmem:[%s1832_s4 + $0x18] sm:$0xff]  }
   0x4   :  { %81 = vmatprep.subr.bf16.mxu0 %v1196_v3  ;;  %224 = vrot.lane.b32.xlu1 %v1338_v7, %s1277_s9  ;;  %v1357_v10 = vld [vmem:[%s1832_s4 + $0x8] sm:$0xff]   ;;  %v1202_v11 = vld [vmem:[%s1828_s0] sm:$0xff]   ;;  %v1381_v14 = vld [vmem:[%s1832_s4 + $0x38] sm:$0xff]  }
   0x5   :  { %220 = vrot.lane.b32.xlu0 %v1343_v8, %s1277_s9  ;;  %v1367_v12 = vld [vmem:[%s1832_s4 + $0x28] sm:$0xff]   ;;  %v1375_v13 = vld [vmem:[%s1832_s4 + $0x20] sm:$0xff]   ;;  %v1387_v15 = vld [vmem:[%s1832_s4 + $0x30] sm:$0xff]  }
   0x6   :  { %v1203_v16 = vld [vmem:[%s1828_s0 + $0x8] sm:$0xff]  }
   0x7   :  { %82 = vmatpush1.bf16.msra.mxu0 %v1198_v4 }
   0x8   :  { %83 = vmatprep.subr.bf16.mxu0 %v1199_v5  ;;  %226 = vrot.lane.b32.xlu1 %v1350_v9, %s1277_s9 }
   0x9   :  { %222 = vrot.lane.b32.xlu0 %v1357_v10, %s1277_s9 }
   0xb   :  { %84 = vmatpush1.bf16.msra.mxu0 %v1201_v6 }
   0xc   :  { %557 = vmatprep.subr.bf16.mxu0 %v1276_v2  ;;  %230 = vrot.lane.b32.xlu1 %v1367_v12, %s1277_s9 }
   0xd   :  { %228 = vrot.lane.b32.xlu0 %v1375_v13, %s1277_s9 }
   0xe   :  { %1144 = vmatmul.mubr.msk.bf16.vlgmr.msra.gmra.mrb[0].mxu0 %vm72_vm0, %v1202_v11 }
   0xf   :  { %121 = vmatprep.mubr.bf16.mxu0 %v1276_v2 }
  0x10   :  { %10 = vsyncpa [#allocation3], 0  ;;  %234 = vrot.lane.b32.xlu1 %v1381_v14, %s1277_s9  ;;  %s1278_s0 = smov 80   ;;  %v1411_v25 = vld [vmem:[%s1832_s4 + $0x40] sm:$0xff]   ;;  %v1430_v38 = vld [vmem:[%s1832_s4 + $0x50] sm:$0xff]   ;;  %s1279_s8 = smov 96  }
  0x11   :  { %232 = vrot.lane.b32.xlu0 %v1387_v15, %s1277_s9  ;;  %v1435_v39 = vld [vmem:[%s1832_s4 + $0x48] sm:$0xff]   ;;  %v1452_v46 = vld [vmem:[%s1832_s4 + $0x58] sm:$0xff]   ;;  %vm717_vm1 = vcmask 261120   ;;  %vm600_vm2 = vcmask 523264   ;;  %s1281_s7 = smov [#allocation2]  }
  0x16   :  { %1145 = vmatmul.mubr.msk.bf16.gmra.mrb[4].mxu0 %vm72_vm0, %v1203_v16 }
  0x17   :  { %589 = vmatprep.mubr.bf16.mxu0 %v1276_v2 }
  0x76   :  { %v225_v35 = vpop.permute.xlu1 %224 }
  0x77   :  { %v221_v22 = vpop.permute.xlu0 %220 }
  0x7a   :  { %v227_v40 = vpop.permute.xlu1 %226 }
  0x7b   :  { %v223_v31 = vpop.permute.xlu0 %222 }
  0x7e   :  { %v231_v47 = vpop.permute.xlu1 %230 }
  0x7f   :  { %v229_v43 = vpop.permute.xlu0 %228 }
  0x82   :  { %v235_v52 = vpop.permute.xlu1 %234 }
  0x83   :  { %v233_v49 = vpop.permute.xlu0 %232 }
  0xe1   :  { %v113_v17 = vpop.f32.mrb[0].mxu0 }
  0xe2   :  { %v115_v18 = vpop.f32.mrb[1].mxu0 }
  0xe3   :  { %v117_v19 = vpop.f32.mrb[2].mxu0 }
  0xe4   :  { %v1402_v20 = vpack.c.bf16 %v117_v19, %v113_v17  ;;  %v119_v21 = vpop.f32.mrb[3].mxu0 }
  0xe5   :  { %v1404_v23 = vpack.c.bf16 %v119_v21, %v115_v18 }
  0xe6   :  { %v256_v24 = vmul.bf16 %v221_v22, %v1402_v20  ;;  %v258_v36 = vmul.bf16 %v225_v35, %v1402_v20  ;;  %v257_v37 = vmul.bf16 %v223_v31, %v1402_v20  ;;  %v260_v44 = vmul.bf16 %v229_v43, %v1402_v20 }
  0xe7   :  { %v259_v45 = vmul.bf16 %v227_v40, %v1402_v20  ;;  %v261_v48 = vmul.bf16 %v231_v47, %v1402_v20  ;;  %v262_v50 = vmul.bf16 %v233_v49, %v1402_v20  ;;  %v263_v53 = vmul.bf16 %v235_v52, %v1402_v20 }
  0xe8   :  { %376 = vrot.lane.b32.xlu0 %v256_v24, %s1278_s0 }
  0xe9   :  { %v123_v26 = vpop.f32.mrb[4].mxu0 }
  0xea   :  { %v125_v27 = vpop.f32.mrb[5].mxu0 }
  0xeb   :  { %v127_v28 = vpop.f32.mrb[6].mxu0 }
  0xec   :  { %v1413_v29 = vpack.c.bf16 %v127_v28, %v123_v26  ;;  %236 = vrot.lane.b32.xlu0 %v1411_v25, %s1277_s9  ;;  %v129_v30 = vpop.f32.mrb[7].mxu0 }
  0xed   :  { %v1417_v32 = vpack.c.bf16 %v129_v30, %v125_v27 }
  0xee   :  { %v269_v33 = vmul.bf16 %v223_v31, %v1413_v29  ;;  %v268_v34 = vmul.bf16 %v221_v22, %v1413_v29  ;;  %v271_v41 = vmul.bf16 %v227_v40, %v1413_v29  ;;  %v270_v42 = vmul.bf16 %v225_v35, %v1413_v29 }
  0xef   :  { %v272_v51 = vmul.bf16 %v229_v43, %v1413_v29  ;;  %v273_v54 = vmul.bf16 %v231_v47, %v1413_v29  ;;  %v274_v55 = vmul.bf16 %v233_v49, %v1413_v29  ;;  %v275_v56 = vmul.bf16 %v235_v52, %v1413_v29 }
  0xf0   :  { %496 = vrot.lane.b32.xlu0 %v269_v33, %s1278_s0  ;;  %494 = vrot.lane.b32.xlu1 %v268_v34, %s1278_s0 }
  0xf4   :  { %380 = vrot.lane.b32.xlu0 %v258_v36, %s1278_s0  ;;  %378 = vrot.lane.b32.xlu1 %v257_v37, %s1278_s0 }
  0xf8   :  { %240 = vrot.lane.b32.xlu0 %v1430_v38, %s1277_s9  ;;  %238 = vrot.lane.b32.xlu1 %v1435_v39, %s1277_s9 }
  0xfc   :  { %500 = vrot.lane.b32.xlu0 %v271_v41, %s1278_s0  ;;  %498 = vrot.lane.b32.xlu1 %v270_v42, %s1278_s0 }
 0x100   :  { %384 = vrot.lane.b32.xlu0 %v260_v44, %s1278_s0  ;;  %382 = vrot.lane.b32.xlu1 %v259_v45, %s1278_s0 }
 0x104   :  { %386 = vrot.lane.b32.xlu0 %v261_v48, %s1278_s0  ;;  %242 = vrot.lane.b32.xlu1 %v1452_v46, %s1277_s9  ;;  %s1280_s9 = smov 32  }
 0x108   :  { %388 = vrot.lane.b32.xlu0 %v262_v50, %s1278_s0  ;;  %502 = vrot.lane.b32.xlu1 %v272_v51, %s1278_s0 }
 0x10c   :  { %390 = vrot.lane.b32.xlu0 %v263_v53, %s1278_s0  ;;  %504 = vrot.lane.b32.xlu1 %v273_v54, %s1278_s0 }
 0x110   :  { %506 = vrot.lane.b32.xlu1 %v274_v55, %s1278_s0 }
 0x114   :  { %508 = vrot.lane.b32.xlu1 %v275_v56, %s1278_s0 }
 0x15a   :  { %v377_v57 = vpop.permute.xlu0 %376 }
 0x15b   :  { %v404_v58 = vsel %vm72_vm0, %v377_v57, 0 }
 0x15c   :  { %440 = vmatpush1.bf16.xpose.msra.mxu1 %v404_v58 }
 0x15d   :  { %441 = vmatprep.subr.bf16.mxu1 %v1276_v2 }
 0x15e   :  { %v237_v59 = vpop.permute.xlu0 %236 }
 0x15f   :  { %v264_v60 = vmul.bf16 %v237_v59, %v1402_v20  ;;  %v276_v61 = vmul.bf16 %v237_v59, %v1413_v29 }
 0x161   :  { %392 = vrot.lane.b32.xlu0 %v264_v60, %s1278_s0  ;;  %510 = vrot.lane.b32.xlu1 %v276_v61, %s1278_s0 }
 0x162   :  { %v497_v62 = vpop.permute.xlu0 %496  ;;  %v495_v63 = vpop.permute.xlu1 %494 }
 0x163   :  { %v522_v0 = vsel %vm72_vm0, %v495_v63, 0  ;;  %v525_v6 = vsel %vm72_vm0, %v497_v62, 0 }
 0x164   :  { %558 = vmatpush1.bf16.xpose.msra.mxu0 %v522_v0 }
 0x165   :  { %559 = vmatprep.subr.bf16.mxu0 %v1276_v2 }
 0x166   :  { %v381_v1 = vpop.permute.xlu0 %380  ;;  %v379_v3 = vpop.permute.xlu1 %378 }
 0x167   :  { %v407_v4 = vsel %vm72_vm0, %v379_v3, 0  ;;  %v410_v19 = vsel %vm72_vm0, %v381_v1, 0 }
 0x168   :  { %442 = vmatpush1.bf16.xpose.msra.mxu1 %v407_v4 }
 0x169   :  { %443 = vmatprep.subr.bf16.mxu1 %v1276_v2 }
 0x16a   :  { %v239_v5 = vpop.permute.xlu1 %238  ;;  %v241_v17 = vpop.permute.xlu0 %240 }
 0x16b   :  { %v265_v11 = vmul.bf16 %v239_v5, %v1402_v20  ;;  %v277_v16 = vmul.bf16 %v239_v5, %v1413_v29  ;;  %v266_v21 = vmul.bf16 %v241_v17, %v1402_v20  ;;  %v278_v22 = vmul.bf16 %v241_v17, %v1413_v29 }
 0x16c   :  { %560 = vmatpush1.bf16.xpose.msra.mxu0 %v525_v6 }
 0x16d   :  { %512 = vrot.lane.b32.xlu1 %v277_v16, %s1278_s0  ;;  %394 = vrot.lane.b32.xlu0 %v265_v11, %s1278_s0 }
 0x16e   :  { %v499_v18 = vpop.permute.xlu1 %498  ;;  %561 = vmatprep.subr.bf16.mxu0 %v1276_v2  ;;  %v501_v27 = vpop.permute.xlu0 %500 }
 0x16f   :  { %v528_v26 = vsel %vm72_vm0, %v499_v18, 0  ;;  %v531_v34 = vsel %vm72_vm0, %v501_v27, 0 }
 0x170   :  { %444 = vmatpush1.bf16.xpose.msra.mxu1 %v410_v19 }
 0x171   :  { %514 = vrot.lane.b32.xlu1 %v278_v22, %s1278_s0  ;;  %396 = vrot.lane.b32.xlu0 %v266_v21, %s1278_s0 }
 0x172   :  { %v383_v24 = vpop.permute.xlu1 %382  ;;  %445 = vmatprep.subr.bf16.mxu1 %v1276_v2  ;;  %v385_v35 = vpop.permute.xlu0 %384 }
 0x173   :  { %v413_v30 = vsel %vm72_vm0, %v383_v24, 0  ;;  %v416_v36 = vsel %vm72_vm0, %v385_v35, 0 }
 0x174   :  { %562 = vmatpush1.bf16.xpose.msra.mxu0 %v528_v26 }
 0x175   :  { %563 = vmatprep.subr.bf16.mxu0 %v1276_v2 }
 0x176   :  { %v243_v28 = vpop.permute.xlu1 %242 }
 0x177   :  { %v267_v31 = vmul.bf16 %v243_v28, %v1402_v20  ;;  %v279_v33 = vmul.bf16 %v243_v28, %v1413_v29 }
 0x178   :  { %446 = vmatpush1.bf16.xpose.msra.mxu1 %v413_v30 }
 0x179   :  { %516 = vrot.lane.b32.xlu1 %v279_v33, %s1278_s0  ;;  %398 = vrot.lane.b32.xlu0 %v267_v31, %s1278_s0 }
 0x17a   :  { %447 = vmatprep.subr.bf16.mxu1 %v1276_v2  ;;  %v503_v37 = vpop.permute.xlu1 %502 }
 0x17b   :  { %v534_v40 = vsel %vm72_vm0, %v503_v37, 0 }
 0x17c   :  { %564 = vmatpush1.bf16.xpose.msra.mxu0 %v531_v34 }
 0x17d   :  { %282 = vrot.lane.b32.xlu1 %v1357_v10, %s1279_s8  ;;  %280 = vrot.lane.b32.xlu0 %v1343_v8, %s1279_s8  ;;  %v387_v10 = vpop.permute.xlu0 %386 }
 0x17e   :  { %565 = vmatprep.subr.bf16.mxu0 %v1276_v2  ;;  %v419_v8 = vsel %vm72_vm0, %v387_v10, 0 }
 0x180   :  { %448 = vmatpush1.bf16.xpose.msra.mxu1 %v416_v36 }
 0x181   :  { %286 = vrot.lane.b32.xlu1 %v1350_v9, %s1279_s8  ;;  %284 = vrot.lane.b32.xlu0 %v1338_v7, %s1279_s8  ;;  %v505_v9 = vpop.permute.xlu1 %504 }
 0x182   :  { %449 = vmatprep.subr.bf16.mxu1 %v1276_v2  ;;  %v537_v7 = vsel %vm72_vm0, %v505_v9, 0 }
 0x184   :  { %566 = vmatpush1.bf16.xpose.msra.mxu0 %v534_v40 }
 0x185   :  { %290 = vrot.lane.b32.xlu1 %v1367_v12, %s1279_s8  ;;  %288 = vrot.lane.b32.xlu0 %v1375_v13, %s1279_s8  ;;  %v389_v12 = vpop.permute.xlu0 %388 }
 0x186   :  { %567 = vmatprep.subr.bf16.mxu0 %v1276_v2  ;;  %v422_v13 = vsel %vm72_vm0, %v389_v12, 0 }
 0x188   :  { %450 = vmatpush1.bf16.xpose.msra.mxu1 %v419_v8 }
 0x189   :  { %294 = vrot.lane.b32.xlu1 %v1381_v14, %s1279_s8  ;;  %292 = vrot.lane.b32.xlu0 %v1387_v15, %s1279_s8  ;;  %v507_v14 = vpop.permute.xlu1 %506  ;;  %v391_v41 = vpop.permute.xlu0 %390 }
 0x18a   :  { %451 = vmatprep.subr.bf16.mxu1 %v1276_v2  ;;  %v540_v15 = vsel %vm72_vm0, %v507_v14, 0  ;;  %v425_v42 = vsel %vm72_vm0, %v391_v41, 0 }
 0x18c   :  { %568 = vmatpush1.bf16.xpose.msra.mxu0 %v537_v7 }
 0x18d   :  { %298 = vrot.lane.b32.xlu1 %v1435_v39, %s1279_s8  ;;  %296 = vrot.lane.b32.xlu0 %v1411_v25, %s1279_s8  ;;  %v509_v43 = vpop.permute.xlu1 %508 }
 0x18e   :  { %569 = vmatprep.subr.bf16.mxu0 %v1276_v2  ;;  %v543_v44 = vsel %vm72_vm0, %v509_v43, 0 }
 0x190   :  { %452 = vmatpush1.bf16.xpose.msra.mxu1 %v422_v13 }
 0x191   :  { %302 = vrot.lane.b32.xlu1 %v1452_v46, %s1279_s8  ;;  %300 = vrot.lane.b32.xlu0 %v1430_v38, %s1279_s8  ;;  %s1125_s8 = sshll.u32 %s1281_s7, 4  ;;  %s1126_s8 = int_to_ptr.vmem [resolvable:$true] %s1125_s8 }
 0x192   :  { %453 = vmatprep.subr.bf16.mxu1 %v1276_v2  ;;  %p1257_p1 = scmp.lt.s32.totalorder %s1126_s8, %s1126_s8 }
 0x194   :  { %570 = vmatpush1.bf16.xpose.msra.mxu0 %v540_v15 }
 0x195   :  { %571 = vmatprep.subr.bf16.mxu0 %v1276_v2 }
 0x198   :  { %454 = vmatpush1.bf16.xpose.msra.mxu1 %v425_v42 }
 0x199   :  { %455 = vmatprep.subr.bf16.mxu1 %v1276_v2 }
 0x19c   :  { %572 = vmatpush1.bf16.xpose.msra.mxu0 %v543_v44 }
 0x19d   :  { %573 = vmatprep.subr.bf16.mxu0 %v1276_v2 }
 0x1d3   :  { %v393_v45 = vpop.permute.xlu0 %392  ;;  %v511_v47 = vpop.permute.xlu1 %510 }
 0x1d4   :  { %v428_v48 = vsel %vm72_vm0, %v393_v45, 0  ;;  %v546_v49 = vsel %vm72_vm0, %v511_v47, 0 }
 0x1d5   :  { %456 = vmatpush1.bf16.xpose.msra.mxu1 %v428_v48  ;;  %574 = vmatpush1.bf16.xpose.msra.mxu0 %v546_v49 }
 0x1d6   :  { %457 = vmatprep.subr.bf16.mxu1 %v1276_v2  ;;  %575 = vmatprep.subr.bf16.mxu0 %v1276_v2 }
 0x1df   :  { %v395_v50 = vpop.permute.xlu0 %394  ;;  %v513_v51 = vpop.permute.xlu1 %512 }
 0x1e0   :  { %v431_v52 = vsel %vm72_vm0, %v395_v50, 0  ;;  %v549_v53 = vsel %vm72_vm0, %v513_v51, 0 }
 0x1e1   :  { %458 = vmatpush1.bf16.xpose.msra.mxu1 %v431_v52  ;;  %576 = vmatpush1.bf16.xpose.msra.mxu0 %v549_v53 }
 0x1e2   :  { %459 = vmatprep.subr.bf16.mxu1 %v1276_v2  ;;  %577 = vmatprep.subr.bf16.mxu0 %v1276_v2 }
 0x1e3   :  { %v397_v54 = vpop.permute.xlu0 %396  ;;  %v515_v55 = vpop.permute.xlu1 %514 }
 0x1e4   :  { %v434_v56 = vsel %vm72_vm0, %v397_v54, 0  ;;  %v552_v57 = vsel %vm72_vm0, %v515_v55, 0 }
 0x1e9   :  { %460 = vmatpush1.bf16.xpose.msra.mxu1 %v434_v56  ;;  %578 = vmatpush1.bf16.xpose.msra.mxu0 %v552_v57 }
 0x1ea   :  { %461 = vmatprep.subr.bf16.mxu1 %v1276_v2  ;;  %579 = vmatprep.subr.bf16.mxu0 %v1276_v2 }
 0x1eb   :  { %v399_v58 = vpop.permute.xlu0 %398  ;;  %v517_v59 = vpop.permute.xlu1 %516 }
 0x1ec   :  { %v437_v61 = vsel %vm72_vm0, %v399_v58, 0  ;;  %v555_v62 = vsel %vm72_vm0, %v517_v59, 0 }
 0x1ef   :  { %v1554_v60 = vpop.permute.xlu0 %280  ;;  %v1562_v1 = vpop.permute.xlu1 %282 }
 0x1f0   :  { %v317_v63 = vmul.bf16 %v1554_v60, %v1404_v23  ;;  %v316_v0 = vmul.bf16 %v1554_v60, %v1402_v20  ;;  %v319_v3 = vmul.bf16 %v1562_v1, %v1404_v23  ;;  %v318_v4 = vmul.bf16 %v1562_v1, %v1402_v20 }
 0x1f1   :  { %462 = vmatpush1.bf16.xpose.msra.mxu1 %v437_v61  ;;  %580 = vmatpush1.bf16.xpose.msra.mxu0 %v555_v62  ;;  %v340_v42 = vmul.bf16 %v1554_v60, %v1413_v29  ;;  %v341_v43 = vmul.bf16 %v1554_v60, %v1417_v32 }
 0x1f2   :  { %671 = vrot.lane.b32.xlu1 %v317_v63, %s1280_s9  ;;  %669 = vrot.lane.b32.xlu0 %v316_v0, %s1280_s9 }
 0x1f3   :  { %745 = vmatprep.subr.bf16.mxu1 %v1276_v2  ;;  %885 = vmatprep.subr.bf16.mxu0 %v1276_v2  ;;  %v1572_v5 = vpop.permute.xlu0 %284  ;;  %v287_v16 = vpop.permute.xlu1 %286 }
 0x1f4   :  { %v321_v6 = vmul.bf16 %v1572_v5, %v1404_v23  ;;  %v320_v11 = vmul.bf16 %v1572_v5, %v1402_v20  ;;  %v323_v17 = vmul.bf16 %v287_v16, %v1404_v23  ;;  %v322_v18 = vmul.bf16 %v287_v16, %v1402_v20 }
 0x1f5   :  { %v344_v44 = vmul.bf16 %v1572_v5, %v1413_v29  ;;  %v345_v45 = vmul.bf16 %v1572_v5, %v1417_v32  ;;  %v346_v47 = vmul.bf16 %v287_v16, %v1413_v29  ;;  %v347_v48 = vmul.bf16 %v287_v16, %v1417_v32 }
 0x1f6   :  { %675 = vrot.lane.b32.xlu1 %v319_v3, %s1280_s9  ;;  %673 = vrot.lane.b32.xlu0 %v318_v4, %s1280_s9 }
 0x1f7   :  { %v289_v19 = vpop.permute.xlu0 %288  ;;  %v291_v24 = vpop.permute.xlu1 %290 }
 0x1f8   :  { %1158 = vmatmul.mubr.msk.bf16.vlgmr.msra.gmra.mrb[0].mxu1 %vm72_vm0, %v1402_v20  ;;  %1159 = vmatmul.mubr.msk.bf16.vlgmr.msra.gmra.mrb[8].mxu0 %vm72_vm0, %v1413_v29  ;;  %v325_v21 = vmul.bf16 %v289_v19, %v1404_v23  ;;  %v324_v22 = vmul.bf16 %v289_v19, %v1402_v20  ;;  %v327_v26 = vmul.bf16 %v291_v24, %v1404_v23 }
 0x1f9   :  { %v326_v27 = vmul.bf16 %v291_v24, %v1402_v20  ;;  %v348_v49 = vmul.bf16 %v289_v19, %v1413_v29  ;;  %v349_v50 = vmul.bf16 %v289_v19, %v1417_v32  ;;  %v350_v51 = vmul.bf16 %v291_v24, %v1413_v29 }
 0x1fa   :  { %679 = vrot.lane.b32.xlu1 %v321_v6, %s1280_s9  ;;  %677 = vrot.lane.b32.xlu0 %v320_v11, %s1280_s9  ;;  %v351_v52 = vmul.bf16 %v291_v24, %v1417_v32 }
 0x1fb   :  { %v293_v28 = vpop.permute.xlu0 %292  ;;  %v295_v33 = vpop.permute.xlu1 %294 }
 0x1fc   :  { %v329_v30 = vmul.bf16 %v293_v28, %v1404_v23  ;;  %v328_v31 = vmul.bf16 %v293_v28, %v1402_v20  ;;  %v331_v34 = vmul.bf16 %v295_v33, %v1404_v23  ;;  %v330_v35 = vmul.bf16 %v295_v33, %v1402_v20 }
 0x1fd   :  { %v352_v53 = vmul.bf16 %v293_v28, %v1413_v29  ;;  %v353_v54 = vmul.bf16 %v293_v28, %v1417_v32  ;;  %v354_v55 = vmul.bf16 %v295_v33, %v1413_v29  ;;  %v355_v56 = vmul.bf16 %v295_v33, %v1417_v32 }
 0x1fe   :  { %683 = vrot.lane.b32.xlu1 %v323_v17, %s1280_s9  ;;  %681 = vrot.lane.b32.xlu0 %v322_v18, %s1280_s9 }
 0x1ff   :  { %v297_v36 = vpop.permute.xlu0 %296  ;;  %v299_v10 = vpop.permute.xlu1 %298 }
 0x200   :  { %v333_v37 = vmul.bf16 %v297_v36, %v1404_v23  ;;  %v332_v40 = vmul.bf16 %v297_v36, %v1402_v20  ;;  %v335_v8 = vmul.bf16 %v299_v10, %v1404_v23  ;;  %v334_v9 = vmul.bf16 %v299_v10, %v1402_v20 }
 0x201   :  { %v356_v57 = vmul.bf16 %v297_v36, %v1413_v29  ;;  %v357_v58 = vmul.bf16 %v297_v36, %v1417_v32  ;;  %v358_v59 = vmul.bf16 %v299_v10, %v1413_v29  ;;  %v359_v60 = vmul.bf16 %v299_v10, %v1417_v32 }
 0x202   :  { %687 = vrot.lane.b32.xlu1 %v325_v21, %s1280_s9  ;;  %685 = vrot.lane.b32.xlu0 %v324_v22, %s1280_s9 }
 0x203   :  { %v301_v7 = vpop.permute.xlu0 %300  ;;  %v1616_v14 = vpop.permute.xlu1 %302 }
 0x204   :  { %v337_v12 = vmul.bf16 %v301_v7, %v1404_v23  ;;  %v336_v13 = vmul.bf16 %v301_v7, %v1402_v20  ;;  %v339_v15 = vmul.bf16 %v1616_v14, %v1404_v23  ;;  %v338_v41 = vmul.bf16 %v1616_v14, %v1402_v20 }
 0x205   :  { %v342_v23 = vmul.bf16 %v1562_v1, %v1413_v29  ;;  %v343_v20 = vmul.bf16 %v1562_v1, %v1417_v32  ;;  %v360_v61 = vmul.bf16 %v301_v7, %v1413_v29  ;;  %v361_v62 = vmul.bf16 %v301_v7, %v1417_v32 }
 0x206   :  { %691 = vrot.lane.b32.xlu1 %v327_v26, %s1280_s9  ;;  %689 = vrot.lane.b32.xlu0 %v326_v27, %s1280_s9 }
 0x20a   :  { %695 = vrot.lane.b32.xlu1 %v329_v30, %s1280_s9  ;;  %693 = vrot.lane.b32.xlu0 %v328_v31, %s1280_s9 }
 0x20e   :  { %699 = vrot.lane.b32.xlu1 %v331_v34, %s1280_s9  ;;  %697 = vrot.lane.b32.xlu0 %v330_v35, %s1280_s9 }
 0x212   :  { %703 = vrot.lane.b32.xlu1 %v333_v37, %s1280_s9  ;;  %701 = vrot.lane.b32.xlu0 %v332_v40, %s1280_s9 }
 0x216   :  { %707 = vrot.lane.b32.xlu1 %v335_v8, %s1280_s9  ;;  %705 = vrot.lane.b32.xlu0 %v334_v9, %s1280_s9 }
 0x21a   :  { %711 = vrot.lane.b32.xlu1 %v337_v12, %s1280_s9  ;;  %709 = vrot.lane.b32.xlu0 %v336_v13, %s1280_s9 }
 0x21e   :  { %715 = vrot.lane.b32.xlu1 %v339_v15, %s1280_s9  ;;  %713 = vrot.lane.b32.xlu0 %v338_v41, %s1280_s9 }
 0x222   :  { %810 = vrot.lane.b32.xlu0 %v340_v42, %s1280_s9  ;;  %812 = vrot.lane.b32.xlu1 %v341_v43, %s1280_s9 }
 0x226   :  { %814 = vrot.lane.b32.xlu0 %v342_v23, %s1280_s9  ;;  %816 = vrot.lane.b32.xlu1 %v343_v20, %s1280_s9 }
 0x22a   :  { %818 = vrot.lane.b32.xlu0 %v344_v44, %s1280_s9  ;;  %820 = vrot.lane.b32.xlu1 %v345_v45, %s1280_s9 }
 0x22e   :  { %822 = vrot.lane.b32.xlu0 %v346_v47, %s1280_s9  ;;  %824 = vrot.lane.b32.xlu1 %v347_v48, %s1280_s9 }
 0x232   :  { %826 = vrot.lane.b32.xlu0 %v348_v49, %s1280_s9  ;;  %828 = vrot.lane.b32.xlu1 %v349_v50, %s1280_s9 }
 0x236   :  { %830 = vrot.lane.b32.xlu0 %v350_v51, %s1280_s9  ;;  %832 = vrot.lane.b32.xlu1 %v351_v52, %s1280_s9 }
 0x23a   :  { %834 = vrot.lane.b32.xlu0 %v352_v53, %s1280_s9  ;;  %836 = vrot.lane.b32.xlu1 %v353_v54, %s1280_s9 }
 0x23e   :  { %838 = vrot.lane.b32.xlu0 %v354_v55, %s1280_s9  ;;  %840 = vrot.lane.b32.xlu1 %v355_v56, %s1280_s9 }
 0x242   :  { %842 = vrot.lane.b32.xlu0 %v356_v57, %s1280_s9  ;;  %844 = vrot.lane.b32.xlu1 %v357_v58, %s1280_s9 }
 0x246   :  { %846 = vrot.lane.b32.xlu0 %v358_v59, %s1280_s9  ;;  %848 = vrot.lane.b32.xlu1 %v359_v60, %s1280_s9 }
 0x24a   :  { %850 = vrot.lane.b32.xlu0 %v360_v61, %s1280_s9  ;;  %852 = vrot.lane.b32.xlu1 %v361_v62, %s1280_s9 }
 0x264   :  { %v670_v63 = vpop.permute.xlu0 %669  ;;  %v672_v0 = vpop.permute.xlu1 %671 }
 0x265   :  { %v718_v1 = vsel %vm717_vm1, %v670_v63, %v672_v0 }
 0x266   :  { %746 = vmatpush1.bf16.msra.mxu1 %v718_v1 }
 0x267   :  { %747 = vmatprep.subr.bf16.mxu1 %v1276_v2 }
 0x268   :  { %v674_v3 = vpop.permute.xlu0 %673  ;;  %v676_v4 = vpop.permute.xlu1 %675 }
 0x269   :  { %v719_v5 = vsel %vm717_vm1, %v674_v3, %v676_v4 }
 0x26a   :  { %748 = vmatpush1.bf16.msra.mxu1 %v719_v5 }
 0x26b   :  { %749 = vmatprep.subr.bf16.mxu1 %v1276_v2 }
 0x26c   :  { %v678_v6 = vpop.permute.xlu0 %677  ;;  %v680_v11 = vpop.permute.xlu1 %679 }
 0x26d   :  { %v720_v16 = vsel %vm717_vm1, %v678_v6, %v680_v11 }
 0x26e   :  { %750 = vmatpush1.bf16.msra.mxu1 %v720_v16 }
 0x26f   :  { %751 = vmatprep.subr.bf16.mxu1 %v1276_v2 }
 0x270   :  { %v682_v17 = vpop.permute.xlu0 %681  ;;  %v684_v18 = vpop.permute.xlu1 %683 }
 0x271   :  { %v721_v19 = vsel %vm717_vm1, %v682_v17, %v684_v18 }
 0x272   :  { %752 = vmatpush1.bf16.msra.mxu1 %v721_v19 }
 0x273   :  { %753 = vmatprep.subr.bf16.mxu1 %v1276_v2 }
 0x274   :  { %v686_v21 = vpop.permute.xlu0 %685  ;;  %v688_v22 = vpop.permute.xlu1 %687 }
 0x275   :  { %v722_v24 = vsel %vm717_vm1, %v686_v21, %v688_v22 }
 0x276   :  { %754 = vmatpush1.bf16.msra.mxu1 %v722_v24 }
 0x277   :  { %755 = vmatprep.subr.bf16.mxu1 %v1276_v2 }
 0x278   :  { %v690_v26 = vpop.permute.xlu0 %689  ;;  %v692_v27 = vpop.permute.xlu1 %691 }
 0x279   :  { %v723_v28 = vsel %vm717_vm1, %v690_v26, %v692_v27 }
 0x27a   :  { %756 = vmatpush1.bf16.msra.mxu1 %v723_v28 }
 0x27b   :  { %757 = vmatprep.subr.bf16.mxu1 %v1276_v2 }
 0x27c   :  { %v694_v30 = vpop.permute.xlu0 %693  ;;  %v696_v31 = vpop.permute.xlu1 %695 }
 0x27d   :  { %v724_v33 = vsel %vm717_vm1, %v694_v30, %v696_v31 }
 0x27e   :  { %758 = vmatpush1.bf16.msra.mxu1 %v724_v33 }
 0x27f   :  { %759 = vmatprep.subr.bf16.mxu1 %v1276_v2 }
 0x280   :  { %v698_v34 = vpop.permute.xlu0 %697  ;;  %v700_v35 = vpop.permute.xlu1 %699 }
 0x281   :  { %v725_v36 = vsel %vm717_vm1, %v698_v34, %v700_v35 }
 0x282   :  { %760 = vmatpush1.bf16.msra.mxu1 %v725_v36 }
 0x283   :  { %761 = vmatprep.subr.bf16.mxu1 %v1276_v2 }
 0x284   :  { %v702_v37 = vpop.permute.xlu0 %701  ;;  %v704_v40 = vpop.permute.xlu1 %703 }
 0x285   :  { %v726_v10 = vsel %vm717_vm1, %v702_v37, %v704_v40 }
 0x286   :  { %762 = vmatpush1.bf16.msra.mxu1 %v726_v10 }
 0x287   :  { %763 = vmatprep.subr.bf16.mxu1 %v1276_v2 }
 0x288   :  { %v706_v8 = vpop.permute.xlu0 %705  ;;  %v708_v9 = vpop.permute.xlu1 %707 }
 0x289   :  { %v727_v7 = vsel %vm717_vm1, %v706_v8, %v708_v9 }
 0x28a   :  { %764 = vmatpush1.bf16.msra.mxu1 %v727_v7  ;;  %v363_v7 = vmul.bf16 %v1616_v14, %v1417_v32 }
 0x28b   :  { %765 = vmatprep.subr.bf16.mxu1 %v1276_v2 }
 0x28c   :  { %v710_v12 = vpop.permute.xlu0 %709  ;;  %v712_v13 = vpop.permute.xlu1 %711 }
 0x28d   :  { %v728_v15 = vsel %vm717_vm1, %v710_v12, %v712_v13  ;;  %v362_v12 = vmul.bf16 %v1616_v14, %v1413_v29 }
 0x28e   :  { %766 = vmatpush1.bf16.msra.mxu1 %v728_v15 }
 0x28f   :  { %767 = vmatprep.subr.bf16.mxu1 %v1276_v2 }
 0x290   :  { %v714_v41 = vpop.permute.xlu0 %713  ;;  %v716_v42 = vpop.permute.xlu1 %715 }
 0x291   :  { %v729_v43 = vsel %vm717_vm1, %v714_v41, %v716_v42 }
 0x292   :  { %768 = vmatpush1.bf16.msra.mxu1 %v729_v43 }
 0x293   :  { %938 = vmatprep.subr.bf16.mxu1 %v1276_v2 }
 0x294   :  { %v811_v23 = vpop.permute.xlu0 %810  ;;  %v813_v20 = vpop.permute.xlu1 %812 }
 0x295   :  { %v858_v44 = vsel %vm717_vm1, %v811_v23, %v813_v20 }
 0x296   :  { %886 = vmatpush1.bf16.msra.mxu0 %v858_v44 }
 0x297   :  { %887 = vmatprep.subr.bf16.mxu0 %v1276_v2 }
 0x298   :  { %v815_v45 = vpop.permute.xlu0 %814  ;;  %v817_v47 = vpop.permute.xlu1 %816 }
 0x299   :  { %v859_v48 = vsel %vm717_vm1, %v815_v45, %v817_v47 }
 0x29a   :  { %888 = vmatpush1.bf16.msra.mxu0 %v859_v48 }
 0x29b   :  { %889 = vmatprep.subr.bf16.mxu0 %v1276_v2 }
 0x29c   :  { %v819_v49 = vpop.permute.xlu0 %818  ;;  %v821_v50 = vpop.permute.xlu1 %820 }
 0x29d   :  { %v860_v51 = vsel %vm717_vm1, %v819_v49, %v821_v50 }
 0x29e   :  { %890 = vmatpush1.bf16.msra.mxu0 %v860_v51 }
 0x29f   :  { %891 = vmatprep.subr.bf16.mxu0 %v1276_v2 }
 0x2a0   :  { %v823_v52 = vpop.permute.xlu0 %822  ;;  %v825_v53 = vpop.permute.xlu1 %824 }
 0x2a1   :  { %v861_v54 = vsel %vm717_vm1, %v823_v52, %v825_v53 }
 0x2a2   :  { %892 = vmatpush1.bf16.msra.mxu0 %v861_v54 }
 0x2a3   :  { %893 = vmatprep.subr.bf16.mxu0 %v1276_v2 }
 0x2a4   :  { %v827_v55 = vpop.permute.xlu0 %826  ;;  %v829_v56 = vpop.permute.xlu1 %828 }
 0x2a5   :  { %v862_v57 = vsel %vm717_vm1, %v827_v55, %v829_v56 }
 0x2a6   :  { %894 = vmatpush1.bf16.msra.mxu0 %v862_v57 }
 0x2a7   :  { %895 = vmatprep.subr.bf16.mxu0 %v1276_v2 }
 0x2a8   :  { %v831_v58 = vpop.permute.xlu0 %830  ;;  %v833_v59 = vpop.permute.xlu1 %832 }
 0x2a9   :  { %v863_v60 = vsel %vm717_vm1, %v831_v58, %v833_v59 }
 0x2aa   :  { %896 = vmatpush1.bf16.msra.mxu0 %v863_v60 }
 0x2ab   :  { %897 = vmatprep.subr.bf16.mxu0 %v1276_v2 }
 0x2ac   :  { %v835_v61 = vpop.permute.xlu0 %834  ;;  %v837_v62 = vpop.permute.xlu1 %836 }
 0x2ad   :  { %v864_v63 = vsel %vm717_vm1, %v835_v61, %v837_v62 }
 0x2ae   :  { %898 = vmatpush1.bf16.msra.mxu0 %v864_v63 }
 0x2af   :  { %899 = vmatprep.subr.bf16.mxu0 %v1276_v2 }
 0x2b0   :  { %v839_v0 = vpop.permute.xlu0 %838  ;;  %v841_v1 = vpop.permute.xlu1 %840 }
 0x2b1   :  { %v865_v3 = vsel %vm717_vm1, %v839_v0, %v841_v1 }
 0x2b2   :  { %900 = vmatpush1.bf16.msra.mxu0 %v865_v3 }
 0x2b3   :  { %901 = vmatprep.subr.bf16.mxu0 %v1276_v2 }
 0x2b4   :  { %v843_v4 = vpop.permute.xlu0 %842  ;;  %v845_v5 = vpop.permute.xlu1 %844 }
 0x2b5   :  { %v866_v6 = vsel %vm717_vm1, %v843_v4, %v845_v5 }
 0x2b6   :  { %902 = vmatpush1.bf16.msra.mxu0 %v866_v6  ;;  %v1243_v6 = vld [vmem:[%s1832_s4] sm:$0xff]  }
 0x2b7   :  { %903 = vmatprep.subr.bf16.mxu0 %v1276_v2 }
 0x2b8   :  { %v847_v11 = vpop.permute.xlu0 %846  ;;  %v849_v16 = vpop.permute.xlu1 %848 }
 0x2b9   :  { %v867_v17 = vsel %vm717_vm1, %v847_v11, %v849_v16  ;;  %v1244_v16 = vld [vmem:[%s1832_s4 + $0x8] sm:$0xff]  }
 0x2ba   :  { %904 = vmatpush1.bf16.msra.mxu0 %v867_v17  ;;  %v1245_v17 = vld [vmem:[%s1832_s4 + $0x10] sm:$0xff]  }
 0x2bb   :  { %905 = vmatprep.subr.bf16.mxu0 %v1276_v2 }
 0x2bc   :  { %v851_v18 = vpop.permute.xlu0 %850  ;;  %v853_v19 = vpop.permute.xlu1 %852 }
 0x2bd   :  { %v868_v21 = vsel %vm717_vm1, %v851_v18, %v853_v19  ;;  %v1246_v18 = vld [vmem:[%s1832_s4 + $0x18] sm:$0xff]   ;;  %v1247_v19 = vld [vmem:[%s1832_s4 + $0x20] sm:$0xff]  }
 0x2be   :  { %906 = vmatpush1.bf16.msra.mxu0 %v868_v21  ;;  %v1248_v21 = vld [vmem:[%s1832_s4 + $0x28] sm:$0xff]  }
 0x2bf   :  { %907 = vmatprep.subr.bf16.mxu0 %v1276_v2 }
 0x2cb   :  { %v473_v22 = vpop.f32.mrb[0].mxu1  ;;  %v591_v24 = vpop.f32.mrb[8].mxu0 }
 0x2cc   :  { %v475_v26 = vpop.f32.mrb[1].mxu1  ;;  %v593_v27 = vpop.f32.mrb[9].mxu0 }
 0x2cd   :  { %v601_v28 = vsel %vm600_vm2, %v475_v26, -inf  ;;  %v609_v30 = vsel %vm600_vm2, %v593_v27, -inf  ;;  %v477_v31 = vpop.f32.mrb[2].mxu1  ;;  %v595_v33 = vpop.f32.mrb[10].mxu0 }
 0x2ce   :  { %v479_v34 = vpop.f32.mrb[3].mxu1  ;;  %v597_v35 = vpop.f32.mrb[11].mxu0  ;;  %v602_v36 = vmax.f32 %v473_v22, %v601_v28  ;;  %v610_v37 = vmax.f32 %v591_v24, %v609_v30 }
 0x2cf   :  { %v605_v40 = vsel %vm600_vm2, %v479_v34, -inf  ;;  %v613_v10 = vsel %vm600_vm2, %v597_v35, -inf }
 0x2d0   :  { %603 = vmax.xlane.f32.xlu0 %v602_v36  ;;  %v606_v8 = vmax.f32 %v477_v31, %v605_v40  ;;  %v614_v9 = vmax.f32 %v595_v33, %v613_v10 }
 0x2d2   :  { %607 = vmax.xlane.f32.xlu1 %v606_v8 }
 0x2d4   :  { %611 = vmax.xlane.f32.xlu0 %v610_v37 }
 0x2d6   :  { %615 = vmax.xlane.f32.xlu1 %v614_v9 }
 0x2e7   :  { %856 = vrot.lane.b32.xlu1 %v363_v7, %s1280_s9 }
 0x2ea   :  { %854 = vrot.lane.b32.xlu0 %v362_v12, %s1280_s9 }
 0x35d   :  { %v604_v13 = vpop.xlane.xlu0 %603 }
 0x35e   :  { %v617_v15 = vsub.f32 %v473_v22, %v604_v13  ;;  %v618_v41 = vsub.f32 %v475_v26, %v604_v13  ;;  %v1249_v22 = vld [vmem:[%s1832_s4 + $0x30] sm:$0xff]   ;;  %v1251_v26 = vld [vmem:[%s1832_s4 + $0x40] sm:$0xff]  }
 0x35f   :  { %v608_v42 = vpop.xlane.xlu1 %607 }
 0x360   :  { %v625_v43 = vmul.f32 1.442695, %v617_v15  ;;  %v627_v23 = vmul.f32 1.442695, %v618_v41  ;;  %v619_v20 = vsub.f32 %v477_v31, %v608_v42  ;;  %v620_v44 = vsub.f32 %v479_v34, %v608_v42 }
 0x361   :  { %v612_v45 = vpop.xlane.xlu0 %611 }
 0x362   :  { %1219 = vpow2.f32 %v625_v43  ;;  %v629_v47 = vmul.f32 1.442695, %v619_v20  ;;  %v631_v48 = vmul.f32 1.442695, %v620_v44  ;;  %v621_v32 = vsub.f32 %v591_v24, %v612_v45  ;;  %v1250_v24 = vld [vmem:[%s1832_s4 + $0x38] sm:$0xff]  }
 0x363   :  { %1221 = vpow2.f32 %v627_v23  ;;  %v622_v49 = vsub.f32 %v593_v27, %v612_v45  ;;  %v616_v50 = vpop.xlane.xlu1 %615 }
 0x364   :  { %1223 = vpow2.f32 %v629_v47  ;;  %v633_v29 = vmul.f32 1.442695, %v621_v32  ;;  %v623_v14 = vsub.f32 %v595_v33, %v616_v50  ;;  %v624_v51 = vsub.f32 %v597_v35, %v616_v50  ;;  %v1164_v47 = vld [vmem:[%s1831_s3] ss:$0 sm:$0xff]  ;;  %s1252_s3 = scalar_lea.vmem %s1126_s8, 512 }
 0x365   :  { %1225 = vpow2.f32 %v631_v48  ;;  %v635_v52 = vmul.f32 1.442695, %v622_v49  ;;  %v855_v55 = vpop.permute.xlu0 %854  ;;  %p1253_p0 = scmp.ne.s32.totalorder %s1126_s8, %s1252_s3  ;;  %p1258_p2 = scmp.lt.s32.totalorder %s1252_s3, %s1252_s3 }
 0x366   :  { %1227 = vpow2.f32 %v633_v29  ;;  %v637_v53 = vmul.f32 1.442695, %v623_v14  ;;  %v639_v54 = vmul.f32 1.442695, %v624_v51 }
 0x367   :  { %1229 = vpow2.f32 %v635_v52  ;;  %v857_v56 = vpop.permute.xlu1 %856  ;;  %p1259_p3 = por %p1258_p2, %p1257_p1 }
 0x368   :  { %1231 = vpow2.f32 %v637_v53  ;;  %v869_v57 = vsel %vm717_vm1, %v855_v55, %v857_v56 }
 0x369   :  { %1233 = vpow2.f32 %v639_v54  ;;  %908 = vmatpush1.bf16.msra.mxu0 %v869_v57  ;;  %p1260_p4 = pnand %p1259_p3, %p1253_p0 }
 0x36a   :  { %979 = vmatprep.subr.bf16.mxu0 %v1276_v2 }
 0x36c   :  { %v1220_v58 = vpop.eup %1219 }
 0x36d   :  { %v1222_v59 = vpop.eup %1221 }
 0x36e   :  { %v1224_v60 = vpop.eup %1223 }
 0x36f   :  { %v1226_v61 = vpop.eup %1225  ;;  %v1734_v62 = vpack.c.bf16 %v1224_v60, %v1220_v58 }
 0x370   :  { %v1228_v63 = vpop.eup %1227  ;;  %v642_v0 = vpack.c.bf16 %v1226_v61, %v1222_v59 }
 0x371   :  { %v1230_v1 = vpop.eup %1229 }
 0x372   :  { %v1232_v3 = vpop.eup %1231  ;;  %1160 = vmatprep.mubr.msk.bf16.mxu1 %vm600_vm2, %v642_v0 }
 0x373   :  { %v1234_v4 = vpop.eup %1233  ;;  %778 = vmatmul.mubr.bf16.vlgmr.msra.gmra.mrb[4].mxu1 %v1734_v62  ;;  %v643_v5 = vpack.c.bf16 %v1232_v3, %v1228_v63 }
 0x374   :  { %939 = vmatpush1.bf16.msra.mxu1 %v1243_v6  ;;  %1162 = vmatprep.mubr.msk.bf16.mxu1 %vm600_vm2, %v642_v0  ;;  %v644_v11 = vpack.c.bf16 %v1234_v4, %v1230_v1 }
 0x375   :  { %940 = vmatprep.subr.bf16.mxu1 %v1276_v2 }
 0x376   :  { %1161 = vmatprep.mubr.msk.bf16.mxu0 %vm600_vm2, %v644_v11 }
 0x377   :  { %918 = vmatmul.mubr.bf16.vlgmr.msra.gmra.mrb[12].mxu0 %v643_v5 }
 0x378   :  { %941 = vmatpush1.bf16.msra.mxu1 %v1244_v16  ;;  %980 = vmatpush1.bf16.msra.mxu0 %v1243_v6 }
 0x379   :  { %1163 = vmatprep.mubr.msk.bf16.mxu0 %vm600_vm2, %v644_v11  ;;  %942 = vmatprep.subr.bf16.mxu1 %v1276_v2 }
 0x37a   :  { %981 = vmatprep.subr.bf16.mxu0 %v1276_v2 }
 0x37c   :  { %943 = vmatpush1.bf16.msra.mxu1 %v1245_v17  ;;  %982 = vmatpush1.bf16.msra.mxu0 %v1244_v16 }
 0x37d   :  { %944 = vmatprep.subr.bf16.mxu1 %v1276_v2  ;;  %983 = vmatprep.subr.bf16.mxu0 %v1276_v2 }
 0x380   :  { %945 = vmatpush1.bf16.msra.mxu1 %v1246_v18  ;;  %984 = vmatpush1.bf16.msra.mxu0 %v1245_v17 }
 0x381   :  { %946 = vmatprep.subr.bf16.mxu1 %v1276_v2  ;;  %985 = vmatprep.subr.bf16.mxu0 %v1276_v2 }
 0x384   :  { %947 = vmatpush1.bf16.msra.mxu1 %v1247_v19  ;;  %986 = vmatpush1.bf16.msra.mxu0 %v1246_v18 }
 0x385   :  { %948 = vmatprep.subr.bf16.mxu1 %v1276_v2  ;;  %987 = vmatprep.subr.bf16.mxu0 %v1276_v2 }
 0x388   :  { %949 = vmatpush1.bf16.msra.mxu1 %v1248_v21  ;;  %988 = vmatpush1.bf16.msra.mxu0 %v1247_v19 }
 0x389   :  { %950 = vmatprep.subr.bf16.mxu1 %v1276_v2  ;;  %989 = vmatprep.subr.bf16.mxu0 %v1276_v2 }
 0x38c   :  { %951 = vmatpush1.bf16.msra.mxu1 %v1249_v22  ;;  %990 = vmatpush1.bf16.msra.mxu0 %v1248_v21 }
 0x38d   :  { %952 = vmatprep.subr.bf16.mxu1 %v1276_v2  ;;  %991 = vmatprep.subr.bf16.mxu0 %v1276_v2 }
 0x390   :  { %953 = vmatpush1.bf16.msra.mxu1 %v1250_v24  ;;  %992 = vmatpush1.bf16.msra.mxu0 %v1249_v22 }
 0x391   :  { %954 = vmatprep.subr.bf16.mxu1 %v1276_v2  ;;  %993 = vmatprep.subr.bf16.mxu0 %v1276_v2 }
 0x394   :  { %955 = vmatpush1.bf16.msra.mxu1 %v1411_v25  ;;  %994 = vmatpush1.bf16.msra.mxu0 %v1250_v24  ;;  %v1216_v25 = vld [vmem:[%s1830_s2] sm:$0xff]  }
 0x395   :  { %956 = vmatprep.subr.bf16.mxu1 %v1276_v2  ;;  %995 = vmatprep.subr.bf16.mxu0 %v1276_v2 }
 0x398   :  { %957 = vmatpush1.bf16.msra.mxu1 %v1435_v39  ;;  %996 = vmatpush1.bf16.msra.mxu0 %v1251_v26 }
 0x399   :  { %958 = vmatprep.subr.bf16.mxu1 %v1276_v2  ;;  %997 = vmatprep.subr.bf16.mxu0 %v1276_v2 }
 0x39c   :  { %959 = vmatpush1.bf16.msra.mxu1 %v1430_v38  ;;  %998 = vmatpush1.bf16.msra.mxu0 %v1435_v39  ;;  %v1217_v39 = vld [vmem:[%s1830_s2 + $0x8] sm:$0xff]  }
 0x39d   :  { %960 = vmatprep.subr.bf16.mxu1 %v1276_v2  ;;  %999 = vmatprep.subr.bf16.mxu0 %v1276_v2 }
 0x3a0   :  { %961 = vmatpush1.bf16.msra.mxu1 %v1452_v46  ;;  %1000 = vmatpush1.bf16.msra.mxu0 %v1430_v38 }
 0x3a1   :  { %1001 = vmatprep.subr.bf16.mxu0 %v1276_v2  ;;  %1175 = vmatprep.subr.bf16.mxu1 %v1216_v25  ;;  %v1218_v2 = vld [vmem:[%s1830_s2 + $0x10] sm:$0xff]  }
 0x3a3   :  { %971 = vmatmul.mubr.bf16.vlgmr.msra.gmra.mrb[8].mxu1 %v1734_v62 }
 0x3a4   :  { %1002 = vmatpush1.bf16.msra.mxu0 %v1452_v46  ;;  %1176 = vmatpush3.bf16.msra.mxu1 %v1216_v25 }
 0x3a5   :  { %1177 = vmatprep.subr.bf16.mxu1 %v1217_v39 }
 0x3a7   :  { %1012 = vmatmul.mubr.bf16.vlgmr.msra.gmra.mrb[16].mxu0 %v643_v5 }
 0x3a8   :  { %1178 = vmatpush3.bf16.msra.mxu1 %v1217_v39 }
 0x3a9   :  { %1179 = vmatprep.subr.bf16.mxu1 %v1218_v2 }
 0x3ac   :  { %1180 = vmatpush3.bf16.msra.mxu1 %v1218_v2 }
 0x446   :  { %v779_v38 = vpop.f32.mrb[4].mxu1 }
 0x447   :  { %v781_v46 = vpop.f32.mrb[5].mxu1 }
 0x448   :  { %v782_v27 = vpop.f32.mrb[6].mxu1 }
 0x449   :  { %v784_v28 = vpop.f32.mrb[7].mxu1 }
 0x44a   :  { %v919_v30 = vpop.f32.mrb[12].mxu0 }
 0x44b   :  { %v921_v31 = vpop.f32.mrb[13].mxu0 }
 0x44c   :  { %v922_v33 = vpop.f32.mrb[14].mxu0 }
 0x44d   :  { %v924_v34 = vpop.f32.mrb[15].mxu0 }
 0x476   :  { %v972_v35 = vpop.f32.mrb[8].mxu1 }
 0x477   :  { %1235 = vrcp.f32 %v972_v35  ;;  %v974_v36 = vpop.f32.mrb[9].mxu1 }
 0x478   :  { %v975_v37 = vpop.f32.mrb[10].mxu1 }
 0x479   :  { %1237 = vrcp.f32 %v975_v37  ;;  %v977_v40 = vpop.f32.mrb[11].mxu1 }
 0x47a   :  { %v1013_v10 = vpop.f32.mrb[16].mxu0 }
 0x47b   :  { %1239 = vrcp.f32 %v1013_v10  ;;  %v1015_v8 = vpop.f32.mrb[17].mxu0 }
 0x47c   :  { %v1016_v9 = vpop.f32.mrb[18].mxu0 }
 0x47d   :  { %1241 = vrcp.f32 %v1016_v9  ;;  %v1018_v7 = vpop.f32.mrb[19].mxu0 }
 0x481   :  { %v1236_v12 = vpop.eup %1235 }
 0x482   :  { %v1024_v13 = vmul.f32 %v1236_v12, %v779_v38 }
 0x483   :  { %v1238_v15 = vpop.eup %1237 }
 0x484   :  { %v1025_v41 = vmul.f32 %v1238_v15, %v782_v27 }
 0x485   :  { %v1240_v42 = vpop.eup %1239 }
 0x486   :  { %v1026_v43 = vmul.f32 %v1240_v42, %v919_v30  ;;  %v1028_v23 = vpack.c.bf16 %v1025_v41, %v1024_v13 }
 0x487   :  { %v1242_v20 = vpop.eup %1241 }
 0x488   :  { %v1027_v44 = vmul.f32 %v1242_v20, %v922_v33  ;;  %1181 = vmatprep.mubr.msk.bf16.mxu1 %vm72_vm0, %v1028_v23 }
 0x48a   :  { %v1029_v45 = vpack.c.bf16 %v1027_v44, %v1026_v43 }
 0x48c   :  { %1182 = vmatmul.mubr.msk.bf16.vlgmr.msra.gmra.mrb[12].mxu1 %vm72_vm0, %v1029_v45 }
 0x55f   :  { %v1183_v48 = vpop.f32.mrb[12].mxu1 }
 0x560   :  { %v1110_v32 = vadd.f32 %v1183_v48, %v1164_v47  ;;  %v1101_v49 = vpop.f32.mrb[13].mxu1 }
 0x561   :  { %v1102_v50 = vadd.f32 %v1164_v47, %v1101_v49  ;;  %v1184_v29 = vpop.f32.mrb[14].mxu1 }
 0x562   :  { %1118 = vst.msk [vmem:[#allocation2 + $0x10] sm:$0xff] %vm72_vm0, %v1110_v32  ;;  %v1113_v14 = vadd.f32 %v1184_v29, %v1164_v47  ;;  %v1104_v51 = vpop.f32.mrb[15].mxu1 }
 0x563   :  { %1116 = vst.msk [vmem:[#allocation2] sm:$0xff] %vm72_vm0, %v1102_v50  ;;  %v1105_v52 = vadd.f32 %v1164_v47, %v1104_v51 }
 0x564   :  { %1119 = vst.msk [vmem:[#allocation2 + $0x18] sm:$0xff] %vm72_vm0, %v1113_v14 }
 0x565   :  { %1117 = vst.msk [vmem:[#allocation2 + $0x8] sm:$0xff] %vm72_vm0, %v1105_v52 }
 0x566   :  { %1263 = shalt.err (!%p1260_p4)
}
 0x567   :  { %s1264_s11 = scalar_lea.hbm %s1833_s5, 512 }
 0x568   :  { %p1265_p5 = scmp.ne.s32.totalorder %s1833_s5, %s1264_s11  ;;  %p1268_p6 = scmp.lt.u32.totalorder %s1264_s11, %s1833_s5 }
 0x56a   :  { %p1270_p7 = pnand %p1268_p6, %p1265_p5 }
 0x56c   :  { %1273 = shalt.err (!%p1270_p7)
}
 0x56d   :  { %s1282_s15 = smov 128   ;;  %s1283_s16 = smov 8  }
 0x56e   :  { %1131 = dma.vmem_to_hbm [thread:$0]  %s1126_s8, 512, %s1833_s5, [#allocation3], %s1282_s15, %s1282_s15, %s1283_s16  }
 0x56f   :  { %1274 = dma.done.wait [#allocation3], 512  }
 0x570   :  { %1275 = vsyncadd [#allocation3], 4294966784 }
 0x571   :  { %1135 = vsyncpa [#allocation3], 1 }

</bundles_post_ra>
